<compile_context>
chip_gen: v6e
topology: v6e:2x2x1
jax: 0.10.0
libtpu: 0.0.40
codegen_flags: <defaults>
</compile_context>

<pallas_src>
import numpy as np
import jax
import jax.numpy as jnp
from jax.experimental import pallas as pl
from jax.experimental.pallas import tpu as pltpu


def _round_up(x, m):
    return ((x + m - 1) // m) * m


def _cdiv(a, b):
    return -(-a // b)


# ----------------------------- Pallas kernel -----------------------------

def _frame_matmul_kernel(x_ref, w_ref, o_ref, acc_ref):
    # grid = (M tiles, K tiles);  x: (TM, TK), w: (TK, Nw) -> o: (TM, Nw)
    @pl.when(pl.program_id(1) == 0)
    def _():
        acc_ref[...] = jnp.zeros_like(acc_ref)

    acc_ref[...] += jnp.dot(x_ref[...], w_ref[...],
                            preferred_element_type=jnp.float32)

    @pl.when(pl.program_id(1) == pl.num_programs(1) - 1)
    def _():
        o_ref[...] = acc_ref[...].astype(o_ref.dtype)


def _plan_tiles(M, K, Nw, in_esize, w_esize, sublane, tm_req):
    """Pick (tm, tk, vmem_limit_bytes) so tiles fit every TPU generation."""
    # K tile: keep the double-buffered DFT weight under a fixed budget so large
    # n_fft fits v7x's 64 MiB physical VMEM and v5e's 16 MiB default scope.
    w_budget = 24 << 20
    if K <= 128 or 2 * K * Nw * w_esize <= w_budget:
        tk = K
    else:
        tk = max(128, (w_budget // (2 * Nw * w_esize) // 128) * 128)

    # M tile: big (HBM roofline), but guarantee >= 2 grid steps for megacore.
    tm = _round_up(max(min(tm_req, M), 1), sublane)
    if M > sublane and _cdiv(M, tm) < 2:
        tm = _round_up(_cdiv(M, 2), sublane)

    def need(tm_, tk_):
        return (2 * tm_ * tk_ * in_esize      # double-buffered frame tiles
                + 2 * tk_ * Nw * w_esize      # double-buffered weight tiles
                + 2 * tm_ * Nw * 4            # double-buffered f32 output tiles
                + tm_ * Nw * 4)               # f32 accumulator scratch

    budget = 48 << 20                         # safe under v7x's 64 MiB VMEM
    while need(tm, tk) > budget and tm > sublane:
        tm = _round_up(tm // 2, sublane)

    vmem_limit = int(min(max(need(tm, tk) * 3 // 2 + (4 << 20), 32 << 20),
                         60 << 20))
    return tm, tk, vmem_limit


def frame_matmul(x, w, tm=512):
    """Tiled (M, K) @ (K, Nw) with a parallel grid over frames and a reduction
    grid over K.  Nw must be a multiple of 128 (lane-dense stores)."""
    M, K = x.shape
    Kw, Nw = w.shape
    assert K == Kw and Nw % 128 == 0
    in_esize = int(x.dtype.itemsize)
    w_esize = int(w.dtype.itemsize)
    sublane = 8 if in_esize >= 4 else (16 if in_esize == 2 else 32)

    tm_eff, tk, vmem_limit = _plan_tiles(M, K, Nw, in_esize, w_esize,
                                         sublane, tm)

    kt = _cdiv(K, tk)
    k_pad = kt * tk
    if k_pad != K:                            # zero K-pad (only when K-tiled)
        x = jnp.pad(x, ((0, 0), (0, k_pad - K)))
        w = jnp.pad(w, ((0, k_pad - K), (0, 0)))
    m_pad = _round_up(M, tm_eff)
    if m_pad != M:
        x = jnp.pad(x, ((0, m_pad - M), (0, 0)))

    out = pl.pallas_call(
        _frame_matmul_kernel,
        out_shape=jax.ShapeDtypeStruct((m_pad, Nw), jnp.float32),
        grid_spec=pltpu.PrefetchScalarGridSpec(
            num_scalar_prefetch=0,
            grid=(m_pad // tm_eff, kt),
            in_specs=[
                pl.BlockSpec((tm_eff, tk), lambda i, k: (i, k)),   # frames tile
                pl.BlockSpec((tk, Nw), lambda i, k: (k, 0)),       # DFT weight tile
            ],
            out_specs=pl.BlockSpec((tm_eff, Nw), lambda i, k: (i, 0)),
            scratch_shapes=[pltpu.VMEM((tm_eff, Nw), jnp.float32)],
        ),
        compiler_params=pltpu.CompilerParams(
            dimension_semantics=("parallel", "arbitrary"),
            vmem_limit_bytes=vmem_limit,
        ),
    )(x, w)
    return out[:M]


# ------------------------------ model wrapper ------------------------------

class TFBSSModelBase:
    """JAX/Pallas port of tf_bss_model_base."""

    def __init__(self, n_fft=16, hop_length=None, win_length=None,
                 compute_dtype=jnp.float32, tm=512):
        self.n_fft = int(n_fft)
        self.win_length = int(win_length) if win_length is not None else self.n_fft
        self.hop_length = int(hop_length) if hop_length is not None else self.win_length // 2
        assert self.win_length == self.n_fft, "win_length != n_fft not needed here"
        # compute_dtype=jnp.bfloat16 is valid on v5e/v6e/v7x (bf16-native MXU,
        # f32 accumulation kept); validate the round-trip tolerance per n_fft.
        self.compute_dtype = compute_dtype
        self.tm = int(tm)

        n = self.n_fft
        F = n // 2 + 1
        F_pad = _round_up(F, 128)
        n_pad = _round_up(n, 128)
        self.n_freq, self.f_pad, self.nfft_pad = F, F_pad, n_pad

        t = np.arange(n)[:, None]
        f = np.arange(F)[None, :]
        ang = 2.0 * np.pi * t * f / n
        # periodic hann window (torch.hann_window default)
        w = 0.5 - 0.5 * np.cos(2.0 * np.pi * np.arange(n) / n)
        self._window_np = w.astype(np.float64)

        # forward onesided DFT, analysis window folded in, each half 128-lane
        # aligned:  cols [0:F] = w*cos, cols [F_pad:F_pad+F] = -w*sin, rest 0.
        fwd = np.zeros((n, 2 * F_pad), np.float64)
        fwd[:, :F] = np.cos(ang) * w[:, None]
        fwd[:, F_pad:F_pad + F] = -np.sin(ang) * w[:, None]
        self.fwd_mat = jnp.asarray(fwd, dtype=compute_dtype)        # (n, 2*F_pad)

        # inverse onesided DFT (irfft) with synthesis window folded in; rows
        # aligned to the same packing, output columns padded to n_pad.
        c = np.full((F, 1), 2.0, dtype=np.float64)
        c[0, 0] = 1.0
        if n % 2 == 0:
            c[-1, 0] = 1.0
        idft_re = (c * np.cos(ang.T)) / n                           # (F, n)
        idft_im = (-c * np.sin(ang.T)) / n                          # (F, n)
        inv = np.zeros((2 * F_pad, n_pad), np.float64)
        inv[:F, :n] = idft_re * w[None, :]
        inv[F_pad:F_pad + F, :n] = idft_im * w[None, :]
        self.inv_mat = jnp.asarray(inv, dtype=compute_dtype)        # (2*F_pad, n_pad)

        self._wsq_cache = {}

    # ---- framing without gather (contiguous slices) ----
    def _frame(self, xp, L):
        n_fft, hop = self.n_fft, self.hop_length
        N = xp.shape[0]
        if n_fft % hop == 0:
            r = n_fft // hop
            chunks = [xp[:, j * hop: j * hop + L * hop].reshape(N, L, 1, hop)
                      for j in range(r)]
            return jnp.concatenate(chunks, axis=2).reshape(N, L, n_fft)
        # fallback for irregular hop: gather
        idx = jnp.arange(L)[:, None] * hop + jnp.arange(n_fft)[None, :]
        return xp[:, idx]

    # ---- Spectrogram(power=None), re/im kept separate, (N, L, F) layout ----
    def _stft_nlf(self, xnt):
        n_fft, hop = self.n_fft, self.hop_length
        N, T = xnt.shape
        pad = n_fft // 2
        assert T > pad, "reflect padding requires T > n_fft // 2"
        xp = jnp.pad(xnt.astype(jnp.float32), ((0, 0), (pad, pad)), mode="reflect")
        if np.dtype(self.compute_dtype) != np.dtype(jnp.float32):
            xp = xp.astype(self.compute_dtype)      # cast upstream of framing
        L = 1 + (xp.shape[-1] - n_fft) // hop
        frames = self._frame(xp, L).reshape(N * L, n_fft)           # (M, n_fft)
        spec = frame_matmul(frames, self.fwd_mat, self.tm)          # (M, 2*F_pad) f32
        F, F_pad = self.n_freq, self.f_pad
        xre = spec[:, :F].reshape(N, L, F)
        xim = spec[:, F_pad:F_pad + F].reshape(N, L, F)
        return xre, xim

    def stft(self, xnt):
        xre, xim = self._stft_nlf(xnt)
        return jax.lax.complex(jnp.transpose(xre, (0, 2, 1)),
                               jnp.transpose(xim, (0, 2, 1)))       # (N, F, L) c64

    # ---- cached 1 / sum(window^2) overlap envelope (host-side constant) ----
    def _get_inv_wsq(self, L, buf_len):
        key = (L, buf_len)
        if key not in self._wsq_cache:
            n_fft, hop = self.n_fft, self.hop_length
            w2 = self._window_np ** 2
            wsq = np.zeros((buf_len,), np.float64)
            for l in range(L):
                wsq[l * hop: l * hop + n_fft] += w2
            inv = np.where(wsq > 1e-11, 1.0 / np.maximum(wsq, 1e-11), 1.0)
            self._wsq_cache[key] = jnp.asarray(inv, jnp.float32)
        return self._wsq_cache[key]

    # ---- overlap-add without scatter (static slice adds) ----
    def _overlap_add(self, frames, L, length):
        n_fft, hop = self.n_fft, self.hop_length
        N = frames.shape[0]
        pad = n_fft // 2
        ola_len = (L - 1) * hop + n_fft
        buf_len = max(ola_len, length + 2 * pad)
        if n_fft % hop == 0:
            r = n_fft // hop
            parts = frames.reshape(N, L, r, hop)
            y = jnp.zeros((N, buf_len), jnp.float32)
            for j in range(r):
                seg = parts[:, :, j, :].reshape(N, L * hop)
                y = y.at[:, j * hop: j * hop + L * hop].add(seg)    # static slice add
        else:
            idx = jnp.arange(L)[:, None] * hop + jnp.arange(n_fft)[None, :]
            y = jnp.zeros((N, buf_len), jnp.float32).at[:, idx].add(frames)
        y = y * self._get_inv_wsq(L, buf_len)[None, :]
        return y[:, pad: pad + length]

    # ---- InverseSpectrogram(..., length), (N, L, F) re/im entry ----
    def _istft_nlf(self, yre, yim, length):
        N, L, F = yre.shape
        F_pad = self.f_pad
        M = N * L
        yre = yre.reshape(M, F).astype(self.compute_dtype)
        yim = yim.reshape(M, F).astype(self.compute_dtype)
        if F_pad != F:
            yre = jnp.pad(yre, ((0, 0), (0, F_pad - F)))
            yim = jnp.pad(yim, ((0, 0), (0, F_pad - F)))
        packed = jnp.concatenate([yre, yim], axis=1)                # (M, 2*F_pad)
        frames = frame_matmul(packed, self.inv_mat, self.tm)        # (M, n_pad) f32
        frames = frames[:, :self.n_fft].reshape(N, L, self.n_fft)
        return self._overlap_add(frames, L, length)

    def istft(self, Ykln, length):
        # torchaudio-compatible entry point: (N, F, L) complex
        yre = jnp.transpose(jnp.real(Ykln).astype(jnp.float32), (0, 2, 1))
        yim = jnp.transpose(jnp.imag(Ykln).astype(jnp.float32), (0, 2, 1))
        return self._istft_nlf(yre, yim, length)

    def separate(self, X_lkn):
        # TODO(synk): base class raises NotImplementedError; identity pass-through here.
        return X_lkn

    def forward(self, xnt):
        xre, xim = self._stft_nlf(xnt)                              # (N, L, F)
        # complex built exactly once, single transpose per component -> (L, F, N)
        xlkn = jax.lax.complex(jnp.transpose(xre, (1, 2, 0)),
                               jnp.transpose(xim, (1, 2, 0)))
        ylkn = self.separate(xlkn)                                  # (L, F, N)
        yre = jnp.transpose(jnp.real(ylkn), (2, 0, 1)).astype(jnp.float32)
        yim = jnp.transpose(jnp.imag(ylkn), (2, 0, 1)).astype(jnp.float32)
        return self._istft_nlf(yre, yim, xnt.shape[-1])


# ---------------------------------- main -----------------------------------

if __name__ == "__main__":
    key = jax.random.PRNGKey(0)
    N, T = 2, 64                       # 2 channels, 64 samples
    xnt = jax.random.normal(key, (N, T), dtype=jnp.float32)

    model = TFBSSModelBase(n_fft=16, hop_length=8, win_length=16)
    fwd = jax.jit(model.forward)
    ynt = jax.block_until_ready(fwd(xnt))

    assert ynt.shape == xnt.shape and ynt.dtype == jnp.float32
    # identity separate() => STFT/iSTFT round-trip should reconstruct the input
    np.testing.assert_allclose(np.asarray(ynt), np.asarray(xnt),
                               rtol=1e-3, atol=1e-3)
    print("KERNEL_OK")
</pallas_src>

<mosaic_0001>
module attributes {stable_mosaic.version = 11 : i64} {
  func.func @_frame_matmul_kernel(%arg0: i32, %arg1: i32, %arg2: memref<16x256xf32, #tpu.memory_space<vmem>>, %arg3: memref<256x128xf32, #tpu.memory_space<vmem>>, %arg4: memref<16x128xf32, #tpu.memory_space<vmem>>, %arg5: memref<16x128xf32, #tpu.memory_space<vmem>>) attributes {dimension_semantics = [#tpu.dimension_semantics<parallel>, #tpu.dimension_semantics<arbitrary>], iteration_bounds = array<i64: 2, 1>, scalar_prefetch = 0 : i64, scratch_operands = 1 : i64, tpu.core_type = #tpu.core_type<tc>, window_params = [{transform_indices = @transform_0, window_bounds = array<i64: 16, 256>}, {transform_indices = @transform_1, window_bounds = array<i64: 256, 128>}, {transform_indices = @transform_2, window_bounds = array<i64: 16, 128>}]} {
    %c0_i32 = arith.constant 0 : i32
    %0 = arith.cmpi eq, %arg1, %c0_i32 : i32
    %1 = arith.extui %0 : i1 to i32
    %c0_i32_0 = arith.constant 0 : i32
    %2 = arith.cmpi ne, %1, %c0_i32_0 : i32
    scf.if %2 {
      %cst_10 = arith.constant 0.000000e+00 : f32
      %12 = vector.broadcast %cst_10 : f32 to vector<16x128xf32>
      %c0_11 = arith.constant 0 : index
      %c0_12 = arith.constant 0 : index
      %13 = vector.load %arg5[%c0_11, %c0_12] : memref<16x128xf32, #tpu.memory_space<vmem>>, vector<16x128xf32>
      tpu.vector_store %arg5[%c0_11, %c0_12], %12 {strides = array<i32>} : memref<16x128xf32, #tpu.memory_space<vmem>>, vector<16x128xf32>,
    } else {
    }
    %c0 = arith.constant 0 : index
    %c0_1 = arith.constant 0 : index
    %3 = vector.load %arg5[%c0, %c0_1] : memref<16x128xf32, #tpu.memory_space<vmem>>, vector<16x128xf32>
    %c0_2 = arith.constant 0 : index
    %c0_3 = arith.constant 0 : index
    %4 = vector.load %arg2[%c0_2, %c0_3] : memref<16x256xf32, #tpu.memory_space<vmem>>, vector<16x256xf32>
    %c0_4 = arith.constant 0 : index
    %c0_5 = arith.constant 0 : index
    %5 = vector.load %arg3[%c0_4, %c0_5] : memref<256x128xf32, #tpu.memory_space<vmem>>, vector<256x128xf32>
    %cst = arith.constant dense<0.000000e+00> : vector<16x128xf32>
    %6 = tpu.matmul %4, %5, %cst {dimension_numbers = #tpu.dot_dimension_numbers<[1], [0], [0], [1], [0, 0, 1, 1], [], []>} : vector<16x256xf32>, vector<256x128xf32>, vector<16x128xf32> -> vector<16x128xf32>
    %7 = arith.addf %3, %6 : vector<16x128xf32>
    %c0_6 = arith.constant 0 : index
    %c0_7 = arith.constant 0 : index
    %8 = vector.load %arg5[%c0_6, %c0_7] : memref<16x128xf32, #tpu.memory_space<vmem>>, vector<16x128xf32>
    tpu.vector_store %arg5[%c0_6, %c0_7], %7 {strides = array<i32>} : memref<16x128xf32, #tpu.memory_space<vmem>>, vector<16x128xf32>,
    %c0_i32_8 = arith.constant 0 : i32
    %9 = arith.cmpi eq, %arg1, %c0_i32_8 : i32
    %10 = arith.extui %9 : i1 to i32
    %c0_i32_9 = arith.constant 0 : i32
    %11 = arith.cmpi ne, %10, %c0_i32_9 : i32
    scf.if %11 {
      %c0_10 = arith.constant 0 : index
      %c0_11 = arith.constant 0 : index
      %12 = vector.load %arg5[%c0_10, %c0_11] : memref<16x128xf32, #tpu.memory_space<vmem>>, vector<16x128xf32>
      %c0_12 = arith.constant 0 : index
      %c0_13 = arith.constant 0 : index
      %13 = vector.load %arg4[%c0_12, %c0_13] : memref<16x128xf32, #tpu.memory_space<vmem>>, vector<16x128xf32>
      tpu.vector_store %arg4[%c0_12, %c0_13], %12 {strides = array<i32>} : memref<16x128xf32, #tpu.memory_space<vmem>>, vector<16x128xf32>,
    } else {
    }
    return
  }
  func.func @transform_0(%arg0: i32, %arg1: i32) -> (i32, i32) {
    %c0_i32 = arith.constant 0 : i32
    return %arg0, %arg1 : i32, i32
  }
  func.func @transform_1(%arg0: i32, %arg1: i32) -> (i32, i32) {
    %c0_i32 = arith.constant 0 : i32
    %c0_i32_0 = arith.constant 0 : i32
    return %arg1, %c0_i32 : i32, i32
  }
  func.func @transform_2(%arg0: i32, %arg1: i32) -> (i32, i32) {
    %c0_i32 = arith.constant 0 : i32
    %c0_i32_0 = arith.constant 0 : i32
    return %arg0, %c0_i32 : i32, i32
  }
}

module attributes {stable_mosaic.version = 11 : i64} {
  func.func @_frame_matmul_kernel(%arg0: i32, %arg1: i32, %arg2: memref<16x16xf32, #tpu.memory_space<vmem>>, %arg3: memref<16x256xf32, #tpu.memory_space<vmem>>, %arg4: memref<16x256xf32, #tpu.memory_space<vmem>>, %arg5: memref<16x256xf32, #tpu.memory_space<vmem>>) attributes {dimension_semantics = [#tpu.dimension_semantics<parallel>, #tpu.dimension_semantics<arbitrary>], iteration_bounds = array<i64: 2, 1>, scalar_prefetch = 0 : i64, scratch_operands = 1 : i64, tpu.core_type = #tpu.core_type<tc>, window_params = [{transform_indices = @transform_0, window_bounds = array<i64: 16, 16>}, {transform_indices = @transform_1, window_bounds = array<i64: 16, 256>}, {transform_indices = @transform_2, window_bounds = array<i64: 16, 256>}]} {
    %c0_i32 = arith.constant 0 : i32
    %0 = arith.cmpi eq, %arg1, %c0_i32 : i32
    %1 = arith.extui %0 : i1 to i32
    %c0_i32_0 = arith.constant 0 : i32
    %2 = arith.cmpi ne, %1, %c0_i32_0 : i32
    scf.if %2 {
      %cst_10 = arith.constant 0.000000e+00 : f32
      %12 = vector.broadcast %cst_10 : f32 to vector<16x256xf32>
      %c0_11 = arith.constant 0 : index
      %c0_12 = arith.constant 0 : index
      %13 = vector.load %arg5[%c0_11, %c0_12] : memref<16x256xf32, #tpu.memory_space<vmem>>, vector<16x256xf32>
      tpu.vector_store %arg5[%c0_11, %c0_12], %12 {strides = array<i32>} : memref<16x256xf32, #tpu.memory_space<vmem>>, vector<16x256xf32>,
    } else {
    }
    %c0 = arith.constant 0 : index
    %c0_1 = arith.constant 0 : index
    %3 = vector.load %arg5[%c0, %c0_1] : memref<16x256xf32, #tpu.memory_space<vmem>>, vector<16x256xf32>
    %c0_2 = arith.constant 0 : index
    %c0_3 = arith.constant 0 : index
    %4 = vector.load %arg2[%c0_2, %c0_3] : memref<16x16xf32, #tpu.memory_space<vmem>>, vector<16x16xf32>
    %c0_4 = arith.constant 0 : index
    %c0_5 = arith.constant 0 : index
    %5 = vector.load %arg3[%c0_4, %c0_5] : memref<16x256xf32, #tpu.memory_space<vmem>>, vector<16x256xf32>
    %cst = arith.constant dense<0.000000e+00> : vector<16x256xf32>
    %6 = tpu.matmul %4, %5, %cst {dimension_numbers = #tpu.dot_dimension_numbers<[1], [0], [0], [1], [0, 0, 1, 1], [], []>} : vector<16x16xf32>, vector<16x256xf32>, vector<16x256xf32> -> vector<16x256xf32>
    %7 = arith.addf %3, %6 : vector<16x256xf32>
    %c0_6 = arith.constant 0 : index
    %c0_7 = arith.constant 0 : index
    %8 = vector.load %arg5[%c0_6, %c0_7] : memref<16x256xf32, #tpu.memory_space<vmem>>, vector<16x256xf32>
    tpu.vector_store %arg5[%c0_6, %c0_7], %7 {strides = array<i32>} : memref<16x256xf32, #tpu.memory_space<vmem>>, vector<16x256xf32>,
    %c0_i32_8 = arith.constant 0 : i32
    %9 = arith.cmpi eq, %arg1, %c0_i32_8 : i32
    %10 = arith.extui %9 : i1 to i32
    %c0_i32_9 = arith.constant 0 : i32
    %11 = arith.cmpi ne, %10, %c0_i32_9 : i32
    scf.if %11 {
      %c0_10 = arith.constant 0 : index
      %c0_11 = arith.constant 0 : index
      %12 = vector.load %arg5[%c0_10, %c0_11] : memref<16x256xf32, #tpu.memory_space<vmem>>, vector<16x256xf32>
      %c0_12 = arith.constant 0 : index
      %c0_13 = arith.constant 0 : index
      %13 = vector.load %arg4[%c0_12, %c0_13] : memref<16x256xf32, #tpu.memory_space<vmem>>, vector<16x256xf32>
      tpu.vector_store %arg4[%c0_12, %c0_13], %12 {strides = array<i32>} : memref<16x256xf32, #tpu.memory_space<vmem>>, vector<16x256xf32>,
    } else {
    }
    return
  }
  func.func @transform_0(%arg0: i32, %arg1: i32) -> (i32, i32) {
    %c0_i32 = arith.constant 0 : i32
    return %arg0, %arg1 : i32, i32
  }
  func.func @transform_1(%arg0: i32, %arg1: i32) -> (i32, i32) {
    %c0_i32 = arith.constant 0 : i32
    %c0_i32_0 = arith.constant 0 : i32
    return %arg1, %c0_i32 : i32, i32
  }
  func.func @transform_2(%arg0: i32, %arg1: i32) -> (i32, i32) {
    %c0_i32 = arith.constant 0 : i32
    %c0_i32_0 = arith.constant 0 : i32
    return %arg0, %c0_i32 : i32, i32
  }
}

</mosaic_0001>

<bundles_post_ra>
// kernel: forward.3
= control target key start
LH: loop header
LB: loop body
LE: loop exit
PB: predicated region body
PF: predicated region fallthrough
CT: control target
= control target key end

     0   :  { %s563_s9 = smov 0   ;;  %s565_s10 = smov 0   ;;  %s699_s0 = inlined_call_operand.vmem [shape: f32[32,256], index: 0, kind: input, shape index: {}]   ;;  %s700_s1 = inlined_call_operand.vmem [shape: f32[256,128], index: 1, kind: input, shape index: {}]   ;;  %s701_s2 = inlined_call_operand.vmem [shape: f32[32,128], index: 2, kind: output, shape index: {}]  }
   0x1   :  { %s567_s11 = smov 0  }
   0x2 LB: > { %s24_s12 = sadd.s32 1, %s542_s10  ;;  %p421_p0 = scmp.ge.s32.totalorder %s546_s11, 1  ;;  %s546_s11 = sphi %s567_s11, %s12_s11   ;;  %s542_s10 = sphi %s565_s10, %s703_s10   ;;  %s538_s9 = sphi %s563_s9, %s702_s9  }
   0x3   : > { %p26_p1 = scmp.ge.s32.totalorder %s24_s12, 2  ;;  %p144_p2 = scmp.lt.s32.totalorder %s546_s11, 3 }
   0x5   : > { %s705_s12 = smov (%p26_p1, %s24_s12), 0  ;;  %p145_p3 = pnand %p421_p0, %p144_p2 }
   0x6   : > { %s422_s21 = sshll.u32 (!%p145_p3), %s538_s9, 1 }
   0x7   : > { %148 = sbr.rel (%p145_p3) target bundleno = 244 (0xf4), region = 28  ;;  %p178_p4 = scmp.lt.s32.totalorder (!%p145_p3), %s422_s21, 3 }
   0xc   : > { %v243_v0 = vld [vmem:[%s700_s1 + $0xf8] sm:$0xff]  ;;  %v242_v2 = vld [vmem:[%s700_s1 + $0xf0] sm:$0xff]  ;;  %v241_v4 = vld [vmem:[%s700_s1 + $0xe8] sm:$0xff]  ;;  %s707_s21 = smov (!%p178_p4, %s422_s21), 3 }
   0xd   : > { %v227_v1 = vld [vmem:[%s700_s1 + $0x78] sm:$0xff]  ;;  %430 = vmatprep.subr.mxu0 %v243_v0  ;;  %468 = vmatprep.subr.mxu1 %v243_v0  ;;  %v226_v3 = vld [vmem:[%s700_s1 + $0x70] sm:$0xff]  ;;  %v225_v5 = vld [vmem:[%s700_s1 + $0x68] sm:$0xff]  ;;  %s429_s19 = sshll.u32 %s707_s21, 4  ;;  %s426_s5 = sshll.u32 %s707_s21, 3 }
   0xe   : > { %431 = vmatpush3.msra.mxu0 %v227_v1  ;;  %484 = vmatpush3.msra.mxu1 %v227_v1  ;;  %v240_v6 = vld [vmem:[%s700_s1 + $0xe0] sm:$0xff]  ;;  %v239_v8 = vld [vmem:[%s700_s1 + $0xd8] sm:$0xff]  ;;  %v238_v10 = vld [vmem:[%s700_s1 + $0xd0] sm:$0xff]  ;;  %s185_s28 = scalar_lea.vmem %s699_s0, %s429_s19  ;;  %s198_s8 = scalar_lea.vmem %s701_s2, %s426_s5 }
   0xf   : > { %432 = vmatprep.subr.mxu0 %v242_v2  ;;  %469 = vmatprep.subr.mxu1 %v242_v2  ;;  %v224_v7 = vld [vmem:[%s700_s1 + $0x60] sm:$0xff]  ;;  %v223_v9 = vld [vmem:[%s700_s1 + $0x58] sm:$0xff]  ;;  %v222_v11 = vld [vmem:[%s700_s1 + $0x50] sm:$0xff] }
  0x10   : > { %433 = vmatpush3.msra.mxu0 %v226_v3  ;;  %485 = vmatpush3.msra.mxu1 %v226_v3  ;;  %v237_v12 = vld [vmem:[%s700_s1 + $0xc8] sm:$0xff]  ;;  %v236_v14 = vld [vmem:[%s700_s1 + $0xc0] sm:$0xff]  ;;  %v235_v16 = vld [vmem:[%s700_s1 + $0xb8] sm:$0xff] }
  0x11   : > { %434 = vmatprep.subr.mxu0 %v241_v4  ;;  %470 = vmatprep.subr.mxu1 %v241_v4  ;;  %v221_v13 = vld [vmem:[%s700_s1 + $0x48] sm:$0xff]  ;;  %v220_v15 = vld [vmem:[%s700_s1 + $0x40] sm:$0xff]  ;;  %v219_v17 = vld [vmem:[%s700_s1 + $0x38] sm:$0xff] }
  0x12   : > { %435 = vmatpush3.msra.mxu0 %v225_v5  ;;  %486 = vmatpush3.msra.mxu1 %v225_v5  ;;  %v234_v18 = vld [vmem:[%s700_s1 + $0xb0] sm:$0xff]  ;;  %v233_v20 = vld [vmem:[%s700_s1 + $0xa8] sm:$0xff]  ;;  %v232_v22 = vld [vmem:[%s700_s1 + $0xa0] sm:$0xff] }
  0x13   : > { %436 = vmatprep.subr.mxu0 %v240_v6  ;;  %471 = vmatprep.subr.mxu1 %v240_v6  ;;  %v218_v19 = vld [vmem:[%s700_s1 + $0x30] sm:$0xff]  ;;  %v217_v21 = vld [vmem:[%s700_s1 + $0x28] sm:$0xff]  ;;  %v216_v23 = vld [vmem:[%s700_s1 + $0x20] sm:$0xff] }
  0x14   : > { %437 = vmatpush3.msra.mxu0 %v224_v7  ;;  %487 = vmatpush3.msra.mxu1 %v224_v7  ;;  %v231_v24 = vld [vmem:[%s700_s1 + $0x98] sm:$0xff]  ;;  %v230_v26 = vld [vmem:[%s700_s1 + $0x90] sm:$0xff]  ;;  %v229_v28 = vld [vmem:[%s700_s1 + $0x88] sm:$0xff] }
  0x15   : > { %438 = vmatprep.subr.mxu0 %v239_v8  ;;  %472 = vmatprep.subr.mxu1 %v239_v8  ;;  %v215_v25 = vld [vmem:[%s700_s1 + $0x18] sm:$0xff]  ;;  %v214_v27 = vld [vmem:[%s700_s1 + $0x10] sm:$0xff]  ;;  %v213_v29 = vld [vmem:[%s700_s1 + $0x8] sm:$0xff] }
  0x16   : > { %439 = vmatpush3.msra.mxu0 %v223_v9  ;;  %488 = vmatpush3.msra.mxu1 %v223_v9  ;;  %v228_v30 = vld [vmem:[%s700_s1 + $0x80] sm:$0xff]  ;;  %v209_v32 = vld [vmem:[%s185_s28 + $0x8] sm:$0xff]  ;;  %v211_v33 = vld [vmem:[%s185_s28 + $0x18] sm:$0xff] }
  0x17   : > { %440 = vmatprep.subr.mxu0 %v238_v10  ;;  %473 = vmatprep.subr.mxu1 %v238_v10  ;;  %v212_v31 = vld [vmem:[%s700_s1] sm:$0xff]  ;;  %v210_v35 = vld [vmem:[%s185_s28 + $0x10] sm:$0xff] }
  0x18   : > { %441 = vmatpush3.msra.mxu0 %v222_v11  ;;  %489 = vmatpush3.msra.mxu1 %v222_v11  ;;  %v208_v34 = vld [vmem:[%s185_s28] sm:$0xff] }
  0x19   : > { %442 = vmatprep.subr.mxu0 %v237_v12  ;;  %474 = vmatprep.subr.mxu1 %v237_v12 }
  0x1a   : > { %443 = vmatpush3.msra.mxu0 %v221_v13  ;;  %490 = vmatpush3.msra.mxu1 %v221_v13 }
  0x1b   : > { %444 = vmatprep.subr.mxu0 %v236_v14  ;;  %475 = vmatprep.subr.mxu1 %v236_v14 }
  0x1c   : > { %445 = vmatpush3.msra.mxu0 %v220_v15  ;;  %491 = vmatpush3.msra.mxu1 %v220_v15 }
  0x1d   : > { %446 = vmatprep.subr.mxu0 %v235_v16  ;;  %476 = vmatprep.subr.mxu1 %v235_v16 }
  0x1e   : > { %447 = vmatpush3.msra.mxu0 %v219_v17  ;;  %492 = vmatpush3.msra.mxu1 %v219_v17 }
  0x1f   : > { %448 = vmatprep.subr.mxu0 %v234_v18  ;;  %477 = vmatprep.subr.mxu1 %v234_v18 }
  0x20   : > { %449 = vmatpush3.msra.mxu0 %v218_v19  ;;  %493 = vmatpush3.msra.mxu1 %v218_v19 }
  0x21   : > { %450 = vmatprep.subr.mxu0 %v233_v20  ;;  %478 = vmatprep.subr.mxu1 %v233_v20 }
  0x22   : > { %451 = vmatpush3.msra.mxu0 %v217_v21  ;;  %494 = vmatpush3.msra.mxu1 %v217_v21 }
  0x23   : > { %452 = vmatprep.subr.mxu0 %v232_v22  ;;  %479 = vmatprep.subr.mxu1 %v232_v22 }
  0x24   : > { %453 = vmatpush3.msra.mxu0 %v216_v23  ;;  %495 = vmatpush3.msra.mxu1 %v216_v23 }
  0x25   : > { %454 = vmatprep.subr.mxu0 %v231_v24  ;;  %480 = vmatprep.subr.mxu1 %v231_v24 }
  0x26   : > { %455 = vmatpush3.msra.mxu0 %v215_v25  ;;  %496 = vmatpush3.msra.mxu1 %v215_v25 }
  0x27   : > { %456 = vmatprep.subr.mxu0 %v230_v26  ;;  %481 = vmatprep.subr.mxu1 %v230_v26 }
  0x28   : > { %457 = vmatpush3.msra.mxu0 %v214_v27  ;;  %497 = vmatpush3.msra.mxu1 %v214_v27 }
  0x29   : > { %458 = vmatprep.subr.mxu0 %v229_v28  ;;  %482 = vmatprep.subr.mxu1 %v229_v28 }
  0x2a   : > { %459 = vmatpush3.msra.mxu0 %v213_v29  ;;  %498 = vmatpush3.msra.mxu1 %v213_v29 }
  0x2b   : > { %460 = vmatprep.subr.mxu0 %v228_v30  ;;  %483 = vmatprep.subr.mxu1 %v228_v30 }
  0x2c   : > { %461 = vmatpush3.msra.mxu0 %v212_v31  ;;  %499 = vmatpush3.msra.mxu1 %v212_v31 }
  0x2d   : > { %308 = vmatprep.mubr.f32.mxu0 %v209_v32  ;;  %313 = vmatprep.mubr.f32.mxu1 %v211_v33 }
  0x2e   : > { %309 = vmatmul.mubr.f32.vlgmr.msra.gmra.mxu0 %v208_v34  ;;  %314 = vmatmul.mubr.f32.vlgmr.msra.gmra.mxu1 %v210_v35 }
  0xee   : > { %v462_v36 = vpop.f32.mrf.mxu0  ;;  %v465_v37 = vpop.f32.mrf.mxu1 }
  0xf0   : > { %v463_v38 = vpop.f32.mrf.mxu0  ;;  %v466_v39 = vpop.f32.mrf.mxu1 }
  0xf1   : > { %v464_v40 = vadd.f32 %v463_v38, %v462_v36  ;;  %v467_v41 = vadd.f32 %v466_v39, %v465_v37 }
  0xf3   : > { %328 = vst [vmem:[%s198_s8] sm:$0xff] %v464_v40  ;;  %329 = vst [vmem:[%s198_s8 + $0x8] sm:$0xff] %v467_v41 }
  0xf4 PF: > { %s12_s11 = sadd.s32 1, %s546_s11   ;;  %s702_s9 = smov %s542_s10 }
  0xf5   : > { %p9_p5 = scmp.ge.s32.totalorder %s12_s11, 4   ;;  %s703_s10 = smov %s705_s12 }
  0xf7   :  { %11 = sbr.rel (!%p9_p5) target bundleno = 2 (0x2), region = 69 }

// kernel: forward.2
= control target key start
LH: loop header
LB: loop body
LE: loop exit
PB: predicated region body
PF: predicated region fallthrough
CT: control target
= control target key end

     0   :  { %s488_s9 = smov 0   ;;  %s490_s10 = smov 0   ;;  %s533_s0 = inlined_call_operand.vmem [shape: f32[32,16], index: 0, kind: input, shape index: {}]   ;;  %s534_s1 = inlined_call_operand.vmem [shape: f32[16,256], index: 1, kind: input, shape index: {}]   ;;  %s535_s2 = inlined_call_operand.vmem [shape: f32[32,256], index: 2, kind: output, shape index: {}]  }
   0x1   :  { %s492_s11 = smov 0  }
   0x2 LB: > { %s24_s12 = sadd.s32 1, %s466_s10  ;;  %p408_p0 = scmp.ge.s32.totalorder %s470_s11, 1  ;;  %s470_s11 = sphi %s492_s11, %s12_s11   ;;  %s466_s10 = sphi %s490_s10, %s537_s10   ;;  %s462_s9 = sphi %s488_s9, %s536_s9  }
   0x3   : > { %p26_p1 = scmp.ge.s32.totalorder %s24_s12, 2  ;;  %p142_p2 = scmp.lt.s32.totalorder %s470_s11, 3 }
   0x5   : > { %s539_s12 = smov (%p26_p1, %s24_s12), 0  ;;  %p143_p3 = pnand %p408_p0, %p142_p2 }
   0x6   : > { %s409_s19 = sshll.u32 (!%p143_p3), %s462_s9, 1 }
   0x7   : > { %146 = sbr.rel (%p143_p3) target bundleno = 214 (0xd6), region = 28  ;;  %p175_p4 = scmp.lt.s32.totalorder (!%p143_p3), %s409_s19, 3 }
   0xc   : > { %v214_v0 = vld [vmem:[%s534_s1 + $0x18] sm:$0xff]  ;;  %v213_v1 = vld [vmem:[%s534_s1 + $0x10] sm:$0xff]  ;;  %v212_v2 = vld [vmem:[%s534_s1 + $0x8] sm:$0xff]  ;;  %s541_s19 = smov (!%p175_p4, %s409_s19), 3  ;;  %v472_v4 = vmov 0.0   ;;  %vm215_vm0 = vcmask 130048  }
   0xd   : > { %250 = vmatprep.subr.mxu0 %v214_v0  ;;  %419 = vmatprep.subr.mxu1 %v214_v0  ;;  %v211_v3 = vld [vmem:[%s534_s1] sm:$0xff]  ;;  %s410_s22 = sshll.u32 %s541_s19, 3  ;;  %s418_s26 = sshll.u32 %s541_s19, 4 }
   0xe   : > { %251 = vmatpush1.msra.mxu0 %v213_v1  ;;  %421 = vmatpush1.msra.mxu1 %v213_v1  ;;  %s181_s25 = scalar_lea.vmem %s533_s0, %s410_s22  ;;  %s195_s29 = scalar_lea.vmem %s535_s2, %s418_s26 }
   0xf   : > { %252 = vmatprep.subr.mxu0 %v212_v2  ;;  %420 = vmatprep.subr.mxu1 %v212_v2  ;;  %v209_v5 = vld [vmem:[%s181_s25] sm:$0xff]  ;;  %v210_v6 = vld [vmem:[%s181_s25 + $0x8] sm:$0xff] }
  0x10   : > { %253 = vmatpush1.msra.mxu0 %v211_v3  ;;  %422 = vmatpush1.msra.mxu1 %v211_v3 }
  0x11   : > { %286 = vmatprep.mubr.f32.mxu0 %v472_v4  ;;  %292 = vmatprep.mubr.f32.mxu1 %v472_v4 }
  0x12   : > { %414 = vmatmul.mubr.msk.f32.vlgmr.msra.gmra.mxu0 %vm215_vm0, %v209_v5  ;;  %415 = vmatmul.mubr.msk.f32.vlgmr.msra.gmra.mxu1 %vm215_vm0, %v210_v6 }
  0xd2   : > { %v288_v7 = vpop.f32.mrf.mxu0  ;;  %v294_v8 = vpop.f32.mrf.mxu1 }
  0xd3   : > { %314 = vst [vmem:[%s195_s29] sm:$0xff] %v288_v7  ;;  %316 = vst [vmem:[%s195_s29 + $0x10] sm:$0xff] %v294_v8 }
  0xd4   : > { %v290_v9 = vpop.f32.mrf.mxu0  ;;  %v296_v10 = vpop.f32.mrf.mxu1 }
  0xd5   : > { %315 = vst [vmem:[%s195_s29 + $0x8] sm:$0xff] %v290_v9  ;;  %317 = vst [vmem:[%s195_s29 + $0x18] sm:$0xff] %v296_v10 }
  0xd6 PF: > { %s12_s11 = sadd.s32 1, %s470_s11   ;;  %s536_s9 = smov %s466_s10 }
  0xd7   : > { %p9_p5 = scmp.ge.s32.totalorder %s12_s11, 4   ;;  %s537_s10 = smov %s539_s12 }
  0xd9   :  { %11 = sbr.rel (!%p9_p5) target bundleno = 2 (0x2), region = 69 }

</bundles_post_ra>
